<compile_context>
chip_gen: v7x
topology: tpu7x:2x2x1
jax: 0.10.0
libtpu: 0.0.40
codegen_flags: <defaults>
</compile_context>

<pallas_src>
import math
from functools import partial

import numpy as np
import jax
import jax.numpy as jnp
from jax.experimental import pallas as pl
from jax.experimental.pallas import tpu as pltpu


# ----------------------------------------------------------------------------
# Fused encoder-stack kernel.  One grid step == one TransformerEncoderLayer:
#   src2 = MHA(x, x, x)
#   x    = LayerNorm1(x + src2)
#   src2 = W2 @ relu(W1 @ x + b1) + b2
#   x    = LayerNorm2(x + src2)
# (dropout layers are identity at inference)
# ----------------------------------------------------------------------------
def encoder_stack_kernel(
    x_ref,        # (SB, D)   flattened (S, B, D) input, s-major rows
    bias_ref,     # (SB, SB)  additive attention mask: 0 same-batch, -1e30 otherwise
    wqkv_ref,     # (D, 3D)   in_proj_weight.T       (layer block)
    wo_ref,       # (D, D)    out_proj.weight.T      (layer block)
    w1_ref,       # (D, H)    linear1.weight.T       (layer block)
    w2_ref,       # (H, D)    linear2.weight.T       (layer block)
    small_ref,    # (8, P)    packed biases / LN params (layer block)
    o_ref,        # (SB, D)   output (written on last layer only)
    act_ref,      # (SB, D)   f32 VMEM scratch: activation resident across layers
    *,
    num_heads,
    eps,
):
    layer = pl.program_id(0)
    n_layers = pl.num_programs(0)

    SB, D = act_ref.shape
    H = w1_ref.shape[-1]
    nh = num_heads
    hd = D // nh
    scale = 1.0 / math.sqrt(hd)

    # Load the input once, at the first layer; afterwards the activation lives in VMEM.
    @pl.when(layer == 0)
    def _():
        act_ref[...] = x_ref[...].astype(jnp.float32)

    x2 = act_ref[...]                                   # (SB, D), f32

    # ---- packed per-layer vector params ---------------------------------
    bqkv = small_ref[0:1, 0:3 * D]                      # (1, 3D)
    bo   = small_ref[1:2, 0:D]                          # (1, D)
    b1   = small_ref[2:3, 0:H]                          # (1, H)
    b2   = small_ref[3:4, 0:D]                          # (1, D)
    g1   = small_ref[4:5, 0:D]
    be1  = small_ref[5:6, 0:D]
    g2   = small_ref[6:7, 0:D]
    be2  = small_ref[7:8, 0:D]

    # ---- multi-head self-attention ---------------------------------------
    qkv = jnp.dot(x2, wqkv_ref[...],
                  preferred_element_type=jnp.float32) + bqkv          # (SB, 3D)

    def split_heads(t):                                                # (SB, D) -> (nh, SB, hd)
        return jnp.stack([t[:, h * hd:(h + 1) * hd] for h in range(nh)], axis=0)

    q = split_heads(qkv[:, 0:D])
    k = split_heads(qkv[:, D:2 * D])
    v = split_heads(qkv[:, 2 * D:3 * D])

    # Batched over heads; batch separation via additive mask (exact).
    s = jnp.einsum('hqd,hkd->hqk', q, k,
                   preferred_element_type=jnp.float32) * scale        # (nh, SB, SB)
    s = s + bias_ref[...][None, :, :]
    s = s - jnp.max(s, axis=-1, keepdims=True)
    p = jnp.exp(s)
    p = p * pl.reciprocal(jnp.sum(p, axis=-1, keepdims=True), approx=True)
    ao = jnp.einsum('hqk,hkd->hqd', p, v,
                    preferred_element_type=jnp.float32)               # (nh, SB, hd)

    attn = jnp.concatenate([ao[h] for h in range(nh)], axis=-1)        # (SB, D)
    attn = jnp.dot(attn, wo_ref[...],
                   preferred_element_type=jnp.float32) + bo

    # ---- add & norm helpers ----------------------------------------------
    def layer_norm(t, gamma, beta):
        mu = jnp.mean(t, axis=-1, keepdims=True)
        var = jnp.mean((t - mu) * (t - mu), axis=-1, keepdims=True)
        return (t - mu) * jax.lax.rsqrt(var + eps) * gamma + beta

    y = layer_norm(x2 + attn, g1, be1)                                 # (SB, D)

    # ---- feed-forward ------------------------------------------------------
    hdn = jnp.dot(y, w1_ref[...], preferred_element_type=jnp.float32) + b1
    hdn = jnp.maximum(hdn, 0.0)                                        # relu
    ff = jnp.dot(hdn, w2_ref[...], preferred_element_type=jnp.float32) + b2

    z = layer_norm(y + ff, g2, be2)                                    # (SB, D)

    act_ref[...] = z                                                   # stays resident

    @pl.when(layer == n_layers - 1)
    def _():
        o_ref[...] = z.astype(o_ref.dtype)


# ----------------------------------------------------------------------------
# Wrapper: one pallas_call for the whole encoder stack.
# x follows PyTorch's default batch_first=False layout: (S, B, D).
# ----------------------------------------------------------------------------
def transformer_encoder_forward(x_sbd, params, num_heads):
    S, B, D = x_sbd.shape
    wqkv_s, wo_s, w1_s, w2_s, small_s = params          # each stacked over layers
    L = wqkv_s.shape[0]
    H = w1_s.shape[-1]
    P = small_s.shape[-1]
    SB = S * B
    assert D % num_heads == 0

    # Pure row-major reshape (no data movement): rows are s-major (row = s*B + b).
    x2 = x_sbd.reshape(SB, D)

    # Additive attention mask keeping each batch element attending only to itself.
    r = np.arange(SB)
    attn_bias = np.where((r[:, None] % B) == (r[None, :] % B),
                         0.0, -1e30).astype(np.float32)
    attn_bias = jnp.asarray(attn_bias)

    kernel = partial(encoder_stack_kernel, num_heads=num_heads, eps=1e-5)

    out2 = pl.pallas_call(
        kernel,
        out_shape=jax.ShapeDtypeStruct((SB, D), x_sbd.dtype),
        grid=(L,),
        in_specs=[
            pl.BlockSpec((SB, D), lambda l: (0, 0)),            # x (flattened tokens)
            pl.BlockSpec((SB, SB), lambda l: (0, 0)),           # attention mask
            pl.BlockSpec((None, D, 3 * D), lambda l: (l, 0, 0)),  # wqkv   (layer l)
            pl.BlockSpec((None, D, D), lambda l: (l, 0, 0)),      # wo     (layer l)
            pl.BlockSpec((None, D, H), lambda l: (l, 0, 0)),      # w1     (layer l)
            pl.BlockSpec((None, H, D), lambda l: (l, 0, 0)),      # w2     (layer l)
            pl.BlockSpec((None, 8, P), lambda l: (l, 0, 0)),      # packed biases/LN
        ],
        out_specs=pl.BlockSpec((SB, D), lambda l: (0, 0)),
        scratch_shapes=[pltpu.VMEM((SB, D), jnp.float32)],        # resident activation
        compiler_params=pltpu.CompilerParams(
            dimension_semantics=("arbitrary",)                    # layers are sequential
        ),
    )(x2, attn_bias, wqkv_s, wo_s, w1_s, w2_s, small_s)

    return out2.reshape(S, B, D)                                  # free reshape back


# ----------------------------------------------------------------------------
# Deterministic parameter init (same shapes as the PyTorch module), stacked over
# layers and pre-packed for the kernel.
# ----------------------------------------------------------------------------
def init_params(key, d_model, hidden_dim, num_layers):
    P = max(3 * d_model, hidden_dim)
    layer_keys = jax.random.split(key, num_layers)
    s = 0.05

    wqkv_l, wo_l, w1_l, w2_l, small_l = [], [], [], [], []
    for k in layer_keys:
        ks = jax.random.split(k, 8)
        in_proj_w = jax.random.normal(ks[0], (3 * d_model, d_model), jnp.float32) * s
        in_proj_b = jax.random.normal(ks[1], (3 * d_model,), jnp.float32) * s
        out_w = jax.random.normal(ks[2], (d_model, d_model), jnp.float32) * s
        out_b = jax.random.normal(ks[3], (d_model,), jnp.float32) * s
        lin1_w = jax.random.normal(ks[4], (hidden_dim, d_model), jnp.float32) * s
        lin1_b = jax.random.normal(ks[5], (hidden_dim,), jnp.float32) * s
        lin2_w = jax.random.normal(ks[6], (d_model, hidden_dim), jnp.float32) * s
        lin2_b = jax.random.normal(ks[7], (d_model,), jnp.float32) * s
        ln1_w = jnp.ones((d_model,), jnp.float32)
        ln1_b = jnp.zeros((d_model,), jnp.float32)
        ln2_w = jnp.ones((d_model,), jnp.float32)
        ln2_b = jnp.zeros((d_model,), jnp.float32)

        wqkv_l.append(in_proj_w.T)          # (D, 3D)
        wo_l.append(out_w.T)                # (D, D)
        w1_l.append(lin1_w.T)               # (D, H)
        w2_l.append(lin2_w.T)               # (H, D)

        small = jnp.zeros((8, P), jnp.float32)
        small = small.at[0, :3 * d_model].set(in_proj_b)
        small = small.at[1, :d_model].set(out_b)
        small = small.at[2, :hidden_dim].set(lin1_b)
        small = small.at[3, :d_model].set(lin2_b)
        small = small.at[4, :d_model].set(ln1_w)
        small = small.at[5, :d_model].set(ln1_b)
        small = small.at[6, :d_model].set(ln2_w)
        small = small.at[7, :d_model].set(ln2_b)
        small_l.append(small)

    return (jnp.stack(wqkv_l), jnp.stack(wo_l), jnp.stack(w1_l),
            jnp.stack(w2_l), jnp.stack(small_l))


if __name__ == "__main__":
    # TransformerEncoder(input_dim=32, hidden_dim=64, num_layers=2, num_heads=4)
    INPUT_DIM = 32
    HIDDEN_DIM = 64
    NUM_LAYERS = 2
    NUM_HEADS = 4
    SEQ = 8
    BATCH = 2

    root = jax.random.PRNGKey(0)
    k_x, k_p = jax.random.split(root)
    x = jax.random.normal(k_x, (SEQ, BATCH, INPUT_DIM), jnp.float32)   # (S, B, D)
    params = init_params(k_p, INPUT_DIM, HIDDEN_DIM, NUM_LAYERS)

    fwd = jax.jit(partial(transformer_encoder_forward, num_heads=NUM_HEADS))
    out = fwd(x, params)
    out = jax.block_until_ready(out)

    assert out.shape == (SEQ, BATCH, INPUT_DIM)
    assert bool(jnp.all(jnp.isfinite(out)))
    print("KERNEL_OK")
</pallas_src>

<mosaic_0001>
module attributes {stable_mosaic.version = 11 : i64} {
  func.func @encoder_stack_kernel(%arg0: i32, %arg1: memref<16x32xf32, #tpu.memory_space<vmem>>, %arg2: memref<16x16xf32, #tpu.memory_space<vmem>>, %arg3: memref<1x32x96xf32, #tpu.memory_space<vmem>>, %arg4: memref<1x32x32xf32, #tpu.memory_space<vmem>>, %arg5: memref<1x32x64xf32, #tpu.memory_space<vmem>>, %arg6: memref<1x64x32xf32, #tpu.memory_space<vmem>>, %arg7: memref<1x8x96xf32, #tpu.memory_space<vmem>>, %arg8: memref<16x32xf32, #tpu.memory_space<vmem>>, %arg9: memref<16x32xf32, #tpu.memory_space<vmem>>) attributes {dimension_semantics = [#tpu.dimension_semantics<arbitrary>], iteration_bounds = array<i64: 2>, scalar_prefetch = 0 : i64, scratch_operands = 1 : i64, tpu.core_type = #tpu.core_type<tc>, window_params = [{pipeline_mode = #tpu.pipeline_mode<synchronous>, transform_indices = @transform_0, window_bounds = array<i64: 16, 32>}, {pipeline_mode = #tpu.pipeline_mode<synchronous>, transform_indices = @transform_1, window_bounds = array<i64: 16, 16>}, {transform_indices = @transform_2, window_bounds = array<i64: 1, 32, 96>}, {transform_indices = @transform_3, window_bounds = array<i64: 1, 32, 32>}, {transform_indices = @transform_4, window_bounds = array<i64: 1, 32, 64>}, {transform_indices = @transform_5, window_bounds = array<i64: 1, 64, 32>}, {transform_indices = @transform_6, window_bounds = array<i64: 1, 8, 96>}, {pipeline_mode = #tpu.pipeline_mode<synchronous>, transform_indices = @transform_7, window_bounds = array<i64: 16, 32>}]} {
    %c0_i32 = arith.constant 0 : i32
    %0 = arith.cmpi eq, %arg0, %c0_i32 : i32
    %1 = arith.extui %0 : i1 to i32
    %c0_i32_0 = arith.constant 0 : i32
    %2 = arith.cmpi ne, %1, %c0_i32_0 : i32
    scf.if %2 {
      %c0_55 = arith.constant 0 : index
      %c0_56 = arith.constant 0 : index
      %153 = vector.load %arg1[%c0_55, %c0_56] : memref<16x32xf32, #tpu.memory_space<vmem>>, vector<16x32xf32>
      %c0_57 = arith.constant 0 : index
      %c0_58 = arith.constant 0 : index
      %154 = vector.load %arg9[%c0_57, %c0_58] : memref<16x32xf32, #tpu.memory_space<vmem>>, vector<16x32xf32>
      tpu.vector_store %arg9[%c0_57, %c0_58], %153 {strides = array<i32>} : memref<16x32xf32, #tpu.memory_space<vmem>>, vector<16x32xf32>,
    } else {
    }
    %c0 = arith.constant 0 : index
    %c0_1 = arith.constant 0 : index
    %3 = vector.load %arg9[%c0, %c0_1] : memref<16x32xf32, #tpu.memory_space<vmem>>, vector<16x32xf32>
    %c0_2 = arith.constant 0 : index
    %c0_3 = arith.constant 0 : index
    %c0_4 = arith.constant 0 : index
    %4 = vector.load %arg7[%c0_2, %c0_3, %c0_4] : memref<1x8x96xf32, #tpu.memory_space<vmem>>, vector<1x1x96xf32>
    %5 = vector.shape_cast %4 : vector<1x1x96xf32> to vector<1x96xf32>
    %c0_5 = arith.constant 0 : index
    %c1 = arith.constant 1 : index
    %c0_6 = arith.constant 0 : index
    %6 = vector.load %arg7[%c0_5, %c1, %c0_6] : memref<1x8x96xf32, #tpu.memory_space<vmem>>, vector<1x1x32xf32>
    %7 = vector.shape_cast %6 : vector<1x1x32xf32> to vector<1x32xf32>
    %c0_7 = arith.constant 0 : index
    %c2 = arith.constant 2 : index
    %c0_8 = arith.constant 0 : index
    %8 = vector.load %arg7[%c0_7, %c2, %c0_8] : memref<1x8x96xf32, #tpu.memory_space<vmem>>, vector<1x1x64xf32>
    %9 = vector.shape_cast %8 : vector<1x1x64xf32> to vector<1x64xf32>
    %c0_9 = arith.constant 0 : index
    %c3 = arith.constant 3 : index
    %c0_10 = arith.constant 0 : index
    %10 = vector.load %arg7[%c0_9, %c3, %c0_10] : memref<1x8x96xf32, #tpu.memory_space<vmem>>, vector<1x1x32xf32>
    %11 = vector.shape_cast %10 : vector<1x1x32xf32> to vector<1x32xf32>
    %c0_11 = arith.constant 0 : index
    %c4 = arith.constant 4 : index
    %c0_12 = arith.constant 0 : index
    %12 = vector.load %arg7[%c0_11, %c4, %c0_12] : memref<1x8x96xf32, #tpu.memory_space<vmem>>, vector<1x1x32xf32>
    %13 = vector.shape_cast %12 : vector<1x1x32xf32> to vector<1x32xf32>
    %c0_13 = arith.constant 0 : index
    %c5 = arith.constant 5 : index
    %c0_14 = arith.constant 0 : index
    %14 = vector.load %arg7[%c0_13, %c5, %c0_14] : memref<1x8x96xf32, #tpu.memory_space<vmem>>, vector<1x1x32xf32>
    %15 = vector.shape_cast %14 : vector<1x1x32xf32> to vector<1x32xf32>
    %c0_15 = arith.constant 0 : index
    %c6 = arith.constant 6 : index
    %c0_16 = arith.constant 0 : index
    %16 = vector.load %arg7[%c0_15, %c6, %c0_16] : memref<1x8x96xf32, #tpu.memory_space<vmem>>, vector<1x1x32xf32>
    %17 = vector.shape_cast %16 : vector<1x1x32xf32> to vector<1x32xf32>
    %c0_17 = arith.constant 0 : index
    %c7 = arith.constant 7 : index
    %c0_18 = arith.constant 0 : index
    %18 = vector.load %arg7[%c0_17, %c7, %c0_18] : memref<1x8x96xf32, #tpu.memory_space<vmem>>, vector<1x1x32xf32>
    %19 = vector.shape_cast %18 : vector<1x1x32xf32> to vector<1x32xf32>
    %c0_19 = arith.constant 0 : index
    %c0_20 = arith.constant 0 : index
    %c0_21 = arith.constant 0 : index
    %20 = vector.load %arg3[%c0_19, %c0_20, %c0_21] : memref<1x32x96xf32, #tpu.memory_space<vmem>>, vector<1x32x96xf32>
    %21 = vector.shape_cast %20 : vector<1x32x96xf32> to vector<32x96xf32>
    %cst = arith.constant dense<0.000000e+00> : vector<16x96xf32>
    %22 = tpu.matmul %3, %21, %cst {dimension_numbers = #tpu.dot_dimension_numbers<[1], [0], [0], [1], [0, 0, 1, 1], [], []>} : vector<16x32xf32>, vector<32x96xf32>, vector<16x96xf32> -> vector<16x96xf32>
    %23 = vector.broadcast %5 : vector<1x96xf32> to vector<16x96xf32>
    %24 = arith.addf %22, %23 : vector<16x96xf32>
    %25 = vector.extract_strided_slice %24 {offsets = [0, 0], sizes = [16, 32], strides = [1, 1]} : vector<16x96xf32> to vector<16x32xf32>
    %26 = vector.extract_strided_slice %25 {offsets = [0, 0], sizes = [16, 8], strides = [1, 1]} : vector<16x32xf32> to vector<16x8xf32>
    %27 = vector.extract_strided_slice %25 {offsets = [0, 8], sizes = [16, 8], strides = [1, 1]} : vector<16x32xf32> to vector<16x8xf32>
    %28 = vector.extract_strided_slice %25 {offsets = [0, 16], sizes = [16, 8], strides = [1, 1]} : vector<16x32xf32> to vector<16x8xf32>
    %29 = vector.extract_strided_slice %25 {offsets = [0, 24], sizes = [16, 8], strides = [1, 1]} : vector<16x32xf32> to vector<16x8xf32>
    %30 = vector.shape_cast %26 : vector<16x8xf32> to vector<1x16x8xf32>
    %31 = vector.shape_cast %27 : vector<16x8xf32> to vector<1x16x8xf32>
    %32 = vector.shape_cast %28 : vector<16x8xf32> to vector<1x16x8xf32>
    %33 = vector.shape_cast %29 : vector<16x8xf32> to vector<1x16x8xf32>
    %34 = tpu.concatenate %30, %31, %32, %33 in 0 : vector<1x16x8xf32>, vector<1x16x8xf32>, vector<1x16x8xf32>, vector<1x16x8xf32> -> vector<4x16x8xf32>
    %35 = vector.extract_strided_slice %24 {offsets = [0, 32], sizes = [16, 32], strides = [1, 1]} : vector<16x96xf32> to vector<16x32xf32>
    %36 = vector.extract_strided_slice %35 {offsets = [0, 0], sizes = [16, 8], strides = [1, 1]} : vector<16x32xf32> to vector<16x8xf32>
    %37 = vector.extract_strided_slice %35 {offsets = [0, 8], sizes = [16, 8], strides = [1, 1]} : vector<16x32xf32> to vector<16x8xf32>
    %38 = vector.extract_strided_slice %35 {offsets = [0, 16], sizes = [16, 8], strides = [1, 1]} : vector<16x32xf32> to vector<16x8xf32>
    %39 = vector.extract_strided_slice %35 {offsets = [0, 24], sizes = [16, 8], strides = [1, 1]} : vector<16x32xf32> to vector<16x8xf32>
    %40 = vector.shape_cast %36 : vector<16x8xf32> to vector<1x16x8xf32>
    %41 = vector.shape_cast %37 : vector<16x8xf32> to vector<1x16x8xf32>
    %42 = vector.shape_cast %38 : vector<16x8xf32> to vector<1x16x8xf32>
    %43 = vector.shape_cast %39 : vector<16x8xf32> to vector<1x16x8xf32>
    %44 = tpu.concatenate %40, %41, %42, %43 in 0 : vector<1x16x8xf32>, vector<1x16x8xf32>, vector<1x16x8xf32>, vector<1x16x8xf32> -> vector<4x16x8xf32>
    %45 = vector.extract_strided_slice %24 {offsets = [0, 64], sizes = [16, 32], strides = [1, 1]} : vector<16x96xf32> to vector<16x32xf32>
    %46 = vector.extract_strided_slice %45 {offsets = [0, 0], sizes = [16, 8], strides = [1, 1]} : vector<16x32xf32> to vector<16x8xf32>
    %47 = vector.extract_strided_slice %45 {offsets = [0, 8], sizes = [16, 8], strides = [1, 1]} : vector<16x32xf32> to vector<16x8xf32>
    %48 = vector.extract_strided_slice %45 {offsets = [0, 16], sizes = [16, 8], strides = [1, 1]} : vector<16x32xf32> to vector<16x8xf32>
    %49 = vector.extract_strided_slice %45 {offsets = [0, 24], sizes = [16, 8], strides = [1, 1]} : vector<16x32xf32> to vector<16x8xf32>
    %50 = vector.shape_cast %46 : vector<16x8xf32> to vector<1x16x8xf32>
    %51 = vector.shape_cast %47 : vector<16x8xf32> to vector<1x16x8xf32>
    %52 = vector.shape_cast %48 : vector<16x8xf32> to vector<1x16x8xf32>
    %53 = vector.shape_cast %49 : vector<16x8xf32> to vector<1x16x8xf32>
    %54 = tpu.concatenate %50, %51, %52, %53 in 0 : vector<1x16x8xf32>, vector<1x16x8xf32>, vector<1x16x8xf32>, vector<1x16x8xf32> -> vector<4x16x8xf32>
    "tpu.trace_start"() <{level = 10 : i32, message = "hqd,hkd->hqk"}> : () -> ()
    %cst_22 = arith.constant dense<0.000000e+00> : vector<4x16x16xf32>
    %55 = tpu.matmul %34, %44, %cst_22 {dimension_numbers = #tpu.dot_dimension_numbers<[2], [2], [1], [1], [0, 0, 0, 1, 1, 1], [0], [0]>} : vector<4x16x8xf32>, vector<4x16x8xf32>, vector<4x16x16xf32> -> vector<4x16x16xf32>
    "tpu.trace_stop"() : () -> ()
    %cst_23 = arith.constant 0.353553385 : f32
    %56 = vector.broadcast %cst_23 : f32 to vector<4x16x16xf32>
    %57 = arith.mulf %55, %56 : vector<4x16x16xf32>
    %c0_24 = arith.constant 0 : index
    %c0_25 = arith.constant 0 : index
    %58 = vector.load %arg2[%c0_24, %c0_25] : memref<16x16xf32, #tpu.memory_space<vmem>>, vector<16x16xf32>
    %59 = vector.shape_cast %58 : vector<16x16xf32> to vector<1x16x16xf32>
    %60 = vector.broadcast %59 : vector<1x16x16xf32> to vector<4x16x16xf32>
    %61 = arith.addf %57, %60 : vector<4x16x16xf32>
    %cst_26 = arith.constant dense<0xFF800000> : vector<4x16xf32>
    %62 = vector.multi_reduction <maximumf>, %61, %cst_26 [2] : vector<4x16x16xf32> to vector<4x16xf32>
    %63 = vector.shape_cast %62 : vector<4x16xf32> to vector<4x16x1xf32>
    %64 = vector.broadcast %63 : vector<4x16x1xf32> to vector<4x16x16xf32>
    %65 = arith.subf %61, %64 : vector<4x16x16xf32>
    %66 = math.exp %65 : vector<4x16x16xf32>
    %cst_27 = arith.constant dense<0.000000e+00> : vector<4x16xf32>
    %67 = vector.multi_reduction <add>, %66, %cst_27 [2] : vector<4x16x16xf32> to vector<4x16xf32>
    %68 = vector.shape_cast %67 : vector<4x16xf32> to vector<4x16x1xf32>
    %69 = tpu.reciprocal %68 {approx = true} : vector<4x16x1xf32> -> vector<4x16x1xf32>
    %70 = vector.broadcast %69 : vector<4x16x1xf32> to vector<4x16x16xf32>
    %71 = arith.mulf %66, %70 : vector<4x16x16xf32>
    "tpu.trace_start"() <{level = 10 : i32, message = "hqk,hkd->hqd"}> : () -> ()
    %cst_28 = arith.constant dense<0.000000e+00> : vector<4x16x8xf32>
    %72 = tpu.matmul %71, %54, %cst_28 {dimension_numbers = #tpu.dot_dimension_numbers<[2], [1], [1], [2], [0, 0, 0, 1, 1, 2], [0], [0]>} : vector<4x16x16xf32>, vector<4x16x8xf32>, vector<4x16x8xf32> -> vector<4x16x8xf32>
    "tpu.trace_stop"() : () -> ()
    %73 = vector.extract_strided_slice %72 {offsets = [0, 0, 0], sizes = [1, 16, 8], strides = [1, 1, 1]} : vector<4x16x8xf32> to vector<1x16x8xf32>
    %74 = vector.shape_cast %73 : vector<1x16x8xf32> to vector<16x8xf32>
    %75 = vector.extract_strided_slice %72 {offsets = [1, 0, 0], sizes = [1, 16, 8], strides = [1, 1, 1]} : vector<4x16x8xf32> to vector<1x16x8xf32>
    %76 = vector.shape_cast %75 : vector<1x16x8xf32> to vector<16x8xf32>
    %77 = vector.extract_strided_slice %72 {offsets = [2, 0, 0], sizes = [1, 16, 8], strides = [1, 1, 1]} : vector<4x16x8xf32> to vector<1x16x8xf32>
    %78 = vector.shape_cast %77 : vector<1x16x8xf32> to vector<16x8xf32>
    %79 = vector.extract_strided_slice %72 {offsets = [3, 0, 0], sizes = [1, 16, 8], strides = [1, 1, 1]} : vector<4x16x8xf32> to vector<1x16x8xf32>
    %80 = vector.shape_cast %79 : vector<1x16x8xf32> to vector<16x8xf32>
    %81 = tpu.concatenate %74, %76, %78, %80 in 1 : vector<16x8xf32>, vector<16x8xf32>, vector<16x8xf32>, vector<16x8xf32> -> vector<16x32xf32>
    %c0_29 = arith.constant 0 : index
    %c0_30 = arith.constant 0 : index
    %c0_31 = arith.constant 0 : index
    %82 = vector.load %arg4[%c0_29, %c0_30, %c0_31] : memref<1x32x32xf32, #tpu.memory_space<vmem>>, vector<1x32x32xf32>
    %83 = vector.shape_cast %82 : vector<1x32x32xf32> to vector<32x32xf32>
    %cst_32 = arith.constant dense<0.000000e+00> : vector<16x32xf32>
    %84 = tpu.matmul %81, %83, %cst_32 {dimension_numbers = #tpu.dot_dimension_numbers<[1], [0], [0], [1], [0, 0, 1, 1], [], []>} : vector<16x32xf32>, vector<32x32xf32>, vector<16x32xf32> -> vector<16x32xf32>
    %85 = vector.broadcast %7 : vector<1x32xf32> to vector<16x32xf32>
    %86 = arith.addf %84, %85 : vector<16x32xf32>
    %87 = arith.addf %3, %86 : vector<16x32xf32>
    %cst_33 = arith.constant dense<0.000000e+00> : vector<16xf32>
    %88 = vector.multi_reduction <add>, %87, %cst_33 [1] : vector<16x32xf32> to vector<16xf32>
    %89 = vector.shape_cast %88 : vector<16xf32> to vector<16x1xf32>
    %cst_34 = arith.constant 3.200000e+01 : f32
    %90 = vector.broadcast %cst_34 : f32 to vector<16x1xf32>
    %91 = arith.divf %89, %90 : vector<16x1xf32>
    %92 = vector.broadcast %91 : vector<16x1xf32> to vector<16x32xf32>
    %93 = arith.subf %87, %92 : vector<16x32xf32>
    %94 = vector.broadcast %91 : vector<16x1xf32> to vector<16x32xf32>
    %95 = arith.subf %87, %94 : vector<16x32xf32>
    %96 = arith.mulf %93, %95 : vector<16x32xf32>
    %cst_35 = arith.constant dense<0.000000e+00> : vector<16xf32>
    %97 = vector.multi_reduction <add>, %96, %cst_35 [1] : vector<16x32xf32> to vector<16xf32>
    %98 = vector.shape_cast %97 : vector<16xf32> to vector<16x1xf32>
    %cst_36 = arith.constant 3.200000e+01 : f32
    %99 = vector.broadcast %cst_36 : f32 to vector<16x1xf32>
    %100 = arith.divf %98, %99 : vector<16x1xf32>
    %101 = vector.broadcast %91 : vector<16x1xf32> to vector<16x32xf32>
    %102 = arith.subf %87, %101 : vector<16x32xf32>
    %cst_37 = arith.constant 9.99999974E-6 : f32
    %103 = vector.broadcast %cst_37 : f32 to vector<16x1xf32>
    %104 = arith.addf %100, %103 : vector<16x1xf32>
    %105 = math.rsqrt %104 : vector<16x1xf32>
    %106 = vector.broadcast %105 : vector<16x1xf32> to vector<16x32xf32>
    %107 = arith.mulf %102, %106 : vector<16x32xf32>
    %108 = vector.broadcast %13 : vector<1x32xf32> to vector<16x32xf32>
    %109 = arith.mulf %107, %108 : vector<16x32xf32>
    %110 = vector.broadcast %15 : vector<1x32xf32> to vector<16x32xf32>
    %111 = arith.addf %109, %110 : vector<16x32xf32>
    %c0_38 = arith.constant 0 : index
    %c0_39 = arith.constant 0 : index
    %c0_40 = arith.constant 0 : index
    %112 = vector.load %arg5[%c0_38, %c0_39, %c0_40] : memref<1x32x64xf32, #tpu.memory_space<vmem>>, vector<1x32x64xf32>
    %113 = vector.shape_cast %112 : vector<1x32x64xf32> to vector<32x64xf32>
    %cst_41 = arith.constant dense<0.000000e+00> : vector<16x64xf32>
    %114 = tpu.matmul %111, %113, %cst_41 {dimension_numbers = #tpu.dot_dimension_numbers<[1], [0], [0], [1], [0, 0, 1, 1], [], []>} : vector<16x32xf32>, vector<32x64xf32>, vector<16x64xf32> -> vector<16x64xf32>
    %115 = vector.broadcast %9 : vector<1x64xf32> to vector<16x64xf32>
    %116 = arith.addf %114, %115 : vector<16x64xf32>
    %cst_42 = arith.constant 0.000000e+00 : f32
    %117 = vector.broadcast %cst_42 : f32 to vector<16x64xf32>
    %118 = arith.maximumf %116, %117 : vector<16x64xf32>
    %c0_43 = arith.constant 0 : index
    %c0_44 = arith.constant 0 : index
    %c0_45 = arith.constant 0 : index
    %119 = vector.load %arg6[%c0_43, %c0_44, %c0_45] : memref<1x64x32xf32, #tpu.memory_space<vmem>>, vector<1x64x32xf32>
    %120 = vector.shape_cast %119 : vector<1x64x32xf32> to vector<64x32xf32>
    %cst_46 = arith.constant dense<0.000000e+00> : vector<16x32xf32>
    %121 = tpu.matmul %118, %120, %cst_46 {dimension_numbers = #tpu.dot_dimension_numbers<[1], [0], [0], [1], [0, 0, 1, 1], [], []>} : vector<16x64xf32>, vector<64x32xf32>, vector<16x32xf32> -> vector<16x32xf32>
    %122 = vector.broadcast %11 : vector<1x32xf32> to vector<16x32xf32>
    %123 = arith.addf %121, %122 : vector<16x32xf32>
    %124 = arith.addf %111, %123 : vector<16x32xf32>
    %cst_47 = arith.constant dense<0.000000e+00> : vector<16xf32>
    %125 = vector.multi_reduction <add>, %124, %cst_47 [1] : vector<16x32xf32> to vector<16xf32>
    %126 = vector.shape_cast %125 : vector<16xf32> to vector<16x1xf32>
    %cst_48 = arith.constant 3.200000e+01 : f32
    %127 = vector.broadcast %cst_48 : f32 to vector<16x1xf32>
    %128 = arith.divf %126, %127 : vector<16x1xf32>
    %129 = vector.broadcast %128 : vector<16x1xf32> to vector<16x32xf32>
    %130 = arith.subf %124, %129 : vector<16x32xf32>
    %131 = vector.broadcast %128 : vector<16x1xf32> to vector<16x32xf32>
    %132 = arith.subf %124, %131 : vector<16x32xf32>
    %133 = arith.mulf %130, %132 : vector<16x32xf32>
    %cst_49 = arith.constant dense<0.000000e+00> : vector<16xf32>
    %134 = vector.multi_reduction <add>, %133, %cst_49 [1] : vector<16x32xf32> to vector<16xf32>
    %135 = vector.shape_cast %134 : vector<16xf32> to vector<16x1xf32>
    %cst_50 = arith.constant 3.200000e+01 : f32
    %136 = vector.broadcast %cst_50 : f32 to vector<16x1xf32>
    %137 = arith.divf %135, %136 : vector<16x1xf32>
    %138 = vector.broadcast %128 : vector<16x1xf32> to vector<16x32xf32>
    %139 = arith.subf %124, %138 : vector<16x32xf32>
    %cst_51 = arith.constant 9.99999974E-6 : f32
    %140 = vector.broadcast %cst_51 : f32 to vector<16x1xf32>
    %141 = arith.addf %137, %140 : vector<16x1xf32>
    %142 = math.rsqrt %141 : vector<16x1xf32>
    %143 = vector.broadcast %142 : vector<16x1xf32> to vector<16x32xf32>
    %144 = arith.mulf %139, %143 : vector<16x32xf32>
    %145 = vector.broadcast %17 : vector<1x32xf32> to vector<16x32xf32>
    %146 = arith.mulf %144, %145 : vector<16x32xf32>
    %147 = vector.broadcast %19 : vector<1x32xf32> to vector<16x32xf32>
    %148 = arith.addf %146, %147 : vector<16x32xf32>
    %c0_52 = arith.constant 0 : index
    %c0_53 = arith.constant 0 : index
    %149 = vector.load %arg9[%c0_52, %c0_53] : memref<16x32xf32, #tpu.memory_space<vmem>>, vector<16x32xf32>
    tpu.vector_store %arg9[%c0_52, %c0_53], %148 {strides = array<i32>} : memref<16x32xf32, #tpu.memory_space<vmem>>, vector<16x32xf32>,
    %c1_i32 = arith.constant 1 : i32
    %150 = arith.cmpi eq, %arg0, %c1_i32 : i32
    %151 = arith.extui %150 : i1 to i32
    %c0_i32_54 = arith.constant 0 : i32
    %152 = arith.cmpi ne, %151, %c0_i32_54 : i32
    scf.if %152 {
      %c0_55 = arith.constant 0 : index
      %c0_56 = arith.constant 0 : index
      %153 = vector.load %arg8[%c0_55, %c0_56] : memref<16x32xf32, #tpu.memory_space<vmem>>, vector<16x32xf32>
      tpu.vector_store %arg8[%c0_55, %c0_56], %148 {strides = array<i32>} : memref<16x32xf32, #tpu.memory_space<vmem>>, vector<16x32xf32>,
    } else {
    }
    return
  }
  func.func @transform_0(%arg0: i32) -> (i32, i32) {
    %c0_i32 = arith.constant 0 : i32
    %c0_i32_0 = arith.constant 0 : i32
    %c0_i32_1 = arith.constant 0 : i32
    return %c0_i32, %c0_i32_0 : i32, i32
  }
  func.func @transform_1(%arg0: i32) -> (i32, i32) {
    %c0_i32 = arith.constant 0 : i32
    %c0_i32_0 = arith.constant 0 : i32
    %c0_i32_1 = arith.constant 0 : i32
    return %c0_i32, %c0_i32_0 : i32, i32
  }
  func.func @transform_2(%arg0: i32) -> (i32, i32, i32) {
    %c0_i32 = arith.constant 0 : i32
    %c0_i32_0 = arith.constant 0 : i32
    %c0_i32_1 = arith.constant 0 : i32
    return %arg0, %c0_i32, %c0_i32_0 : i32, i32, i32
  }
  func.func @transform_3(%arg0: i32) -> (i32, i32, i32) {
    %c0_i32 = arith.constant 0 : i32
    %c0_i32_0 = arith.constant 0 : i32
    %c0_i32_1 = arith.constant 0 : i32
    return %arg0, %c0_i32, %c0_i32_0 : i32, i32, i32
  }
  func.func @transform_4(%arg0: i32) -> (i32, i32, i32) {
    %c0_i32 = arith.constant 0 : i32
    %c0_i32_0 = arith.constant 0 : i32
    %c0_i32_1 = arith.constant 0 : i32
    return %arg0, %c0_i32, %c0_i32_0 : i32, i32, i32
  }
  func.func @transform_5(%arg0: i32) -> (i32, i32, i32) {
    %c0_i32 = arith.constant 0 : i32
    %c0_i32_0 = arith.constant 0 : i32
    %c0_i32_1 = arith.constant 0 : i32
    return %arg0, %c0_i32, %c0_i32_0 : i32, i32, i32
  }
  func.func @transform_6(%arg0: i32) -> (i32, i32, i32) {
    %c0_i32 = arith.constant 0 : i32
    %c0_i32_0 = arith.constant 0 : i32
    %c0_i32_1 = arith.constant 0 : i32
    return %arg0, %c0_i32, %c0_i32_0 : i32, i32, i32
  }
  func.func @transform_7(%arg0: i32) -> (i32, i32) {
    %c0_i32 = arith.constant 0 : i32
    %c0_i32_0 = arith.constant 0 : i32
    %c0_i32_1 = arith.constant 0 : i32
    return %c0_i32, %c0_i32_0 : i32, i32
  }
}

</mosaic_0001>

<bundles_post_ra>
// kernel: transformer_encoder_forward.1
= control target key start
LH: loop header
LB: loop body
LE: loop exit
PB: predicated region body
PF: predicated region fallthrough
CT: control target
= control target key end

     0   :  { %12 = vsyncpa [#allocation4], 0  ;;  %s2689_s0 = inlined_call_operand.hbm [shape: f32[16,32], index: 0, kind: input, shape index: {}]   ;;  %s2690_s1 = inlined_call_operand.hbm [shape: f32[16,16], index: 1, kind: input, shape index: {}]   ;;  %s2691_s2 = inlined_call_operand.vmem [shape: f32[2,32,96], index: 2, kind: input, shape index: {}]   ;;  %s2692_s3 = inlined_call_operand.vmem [shape: f32[2,32,32], index: 3, kind: input, shape index: {}]   ;;  %s2693_s4 = inlined_call_operand.vmem [shape: f32[2,32,64], index: 4, kind: input, shape index: {}]   ;;  %s2694_s5 = inlined_call_operand.vmem [shape: f32[2,64,32], index: 5, kind: input, shape index: {}]   ;;  %s2695_s6 = inlined_call_operand.vmem [shape: f32[2,8,96], index: 6, kind: input, shape index: {}]   ;;  %s2696_s7 = inlined_call_operand.hbm [shape: f32[16,32], index: 7, kind: output, shape index: {}]  }
   0x1   :  { %13 = vsyncpa [#allocation7], 0 }
   0x2   :  { %14 = vsyncpa [#allocation5], 0  ;;  %s2409_s24 = smov 0  }
   0x3 LB: > { %s2415_s25 = sadd.s32 4294967295, %s2353_s24   ;;  %p1812_p0 = scmp.ge.s32.totalorder %s2353_s24, 1  ;;  %s2353_s24 = sphi %s2409_s24, %s20_s24  }
   0x4   : > { %p218_p1 = scmp.lt.s32.totalorder %s2353_s24, 3  ;;  %s2355_s26 = smov [#allocation3]  }
   0x5   : > { %s230_s27 = sshll.u32 %s2355_s26, 4  ;;  %p2697_p4 = scmp.eq.s32.totalorder %s2415_s25, 0  ;;  %s231_s27 = int_to_ptr.vmem [resolvable:$true] %s230_s27 }
   0x6   : > { %p2420_p3 = pnand %p1812_p0, %p218_p1  ;;  %s2356_s29 = smov [#allocation6]  }
   0x7   : > { %s243_s30 = sshll.u32 %s2356_s29, 4  ;;  %s2253_s11 = scalar_lea.hbm %s2689_s0, 256  ;;  %s2433_s30 = int_to_ptr.vmem [resolvable:$true] %s243_s30 }
   0x8   : > { %s2699_s28 = scalar_select %p2420_p3, 1, 0 }
   0x9   : > { %p2138_p5 = pneg %p2420_p3  ;;  %p2254_p7 = scmp.ne.s32.totalorder %s2689_s0, %s2253_s11 }
   0xa   : > { %p2260_p11 = scmp.lt.u32.totalorder %s2253_s11, %s2689_s0 }
   0xb   : > { %p2429_p6 = pnand %p2697_p4, %p2138_p5 }
   0xd   : > { %p2255_p8 = pneg %p2429_p6 }
   0xf   : > { %p2256_p9 = pnand %p2255_p8, %p2254_p7 }
  0x11   : > { %p2257_p10 = pneg %p2256_p9 }
  0x13   : > { %p2262_p12 = pnand %p2260_p11, %p2257_p10 }
  0x15   : > { %2265 = shalt.err (!%p2262_p12)
}
  0x16   : > { %s2266_s16 = scalar_lea.vmem %s231_s27, 256  ;;  %p2274_p5 = scmp.lt.s32.totalorder %s231_s27, %s231_s27 }
  0x17   : > { %p2267_p13 = scmp.ne.s32.totalorder %s231_s27, %s2266_s16  ;;  %p2275_p2 = scmp.lt.s32.totalorder %s2266_s16, %s2266_s16 }
  0x19   : > { %p2269_p0 = pnand %p2267_p13, %p2255_p8  ;;  %p2276_p4 = por %p2275_p2, %p2274_p5 }
  0x1b   : > { %p2270_p1 = pneg %p2269_p0 }
  0x1d   : > { %p2277_p3 = pnand %p2276_p4, %p2270_p1 }
  0x1f   : > { %2280 = shalt.err (!%p2277_p3)
}
  0x20   : > { %s2357_s17 = smov 128   ;;  %s2358_s18 = smov 8  }
  0x21   : > { %2141 = dma.hbm_to_vmem [thread:$0]  (!%p2429_p6), %s2689_s0, 256, %s231_s27, [#allocation4], %s2357_s17, %s2357_s17, %s2358_s18  }
  0x22   : > { %s2281_s23 = scalar_lea.hbm %s2690_s1, 256 }
  0x23   : > { %p2282_p7 = scmp.ne.s32.totalorder %s2690_s1, %s2281_s23  ;;  %p2288_p4 = scmp.lt.u32.totalorder %s2281_s23, %s2690_s1 }
  0x25   : > { %p2284_p2 = pnand %p2282_p7, %p2255_p8 }
  0x27   : > { %p2285_p3 = pneg %p2284_p2 }
  0x29   : > { %p2290_p9 = pnand %p2288_p4, %p2285_p3 }
  0x2b   : > { %2293 = shalt.err (!%p2290_p9)
}
  0x2c   : > { %s2294_s27 = scalar_lea.vmem %s2433_s30, 256  ;;  %p2302_p13 = scmp.lt.s32.totalorder %s2433_s30, %s2433_s30 }
  0x2d   : > { %p2295_p10 = scmp.ne.s32.totalorder %s2433_s30, %s2294_s27  ;;  %p2303_p0 = scmp.lt.s32.totalorder %s2294_s27, %s2294_s27 }
  0x2f   : > { %p2297_p11 = pnand %p2295_p10, %p2255_p8  ;;  %p2304_p1 = por %p2303_p0, %p2302_p13 }
  0x31   : > { %p2298_p12 = pneg %p2297_p11 }
  0x33   : > { %p2305_p5 = pnand %p2304_p1, %p2298_p12 }
  0x35   : > { %2308 = shalt.err (!%p2305_p5)
}
  0x36   : > { %2144 = dma.hbm_to_vmem [thread:$0]  (!%p2429_p6), %s2690_s1, 256, %s2433_s30, [#allocation7], %s2357_s17, %s2357_s17, %s2358_s18  }
  0x37   : > { %p2701_p7 = scmp.ne.s32.totalorder %s2699_s28, 0 }
  0x38   : > { %p2702_p2 = scmp.eq.s32.totalorder (!%p2701_p7), %s2415_s25, 0 }
  0x39   : > { %298 = sbr.rel (%p2701_p7) target bundleno = 2783 (0xadf), region = 48 }
  0x40   : > { %2340 = dma.done.wait (%p2702_p2), [#allocation4], 256   ;;  %p2703_p8 = pmov %p2702_p2 }
  0x41   : > { %p2704_p3 = pmov %p2702_p2 }
  0x42   : > { %2342 = vsyncadd (%p2703_p8), [#allocation4], 4294967040 }
  0x43   : > { %2344 = dma.done.wait (%p2704_p3), [#allocation7], 256   ;;  %p2705_p4 = pmov %p2702_p2 }
  0x44   : > { %p348_p9 = scmp.lt.s32.totalorder %s2415_s25, 1  ;;  %p2706_p6 = scmp.ne.s32.totalorder %s2415_s25, 0 }
  0x45   : > { %2346 = vsyncadd (%p2705_p4), [#allocation7], 4294967040  ;;  %v376_v0 = vld [vmem:[#allocation3] sm:$0xff] (!%p2706_p6)  ;;  %vm378_vm0 = vcmask (!%p2706_p6), 261120   ;;  %v377_v1 = vld [vmem:[#allocation3 + $0x8] sm:$0xff] (!%p2706_p6) }
  0x46   : > { %s349_s8 = scalar_select %p348_p9, %s2415_s25, 1 }
  0x47   : > { %375 = sbr.rel (%p2706_p6) target bundleno = 78 (0x4e), region = 60  ;;  %379 = vst.msk [vmem:[#allocation2] sm:$0xff] (!%p2706_p6), %vm378_vm0, %v376_v0  ;;  %380 = vst.msk [vmem:[#allocation2 + $0x8] sm:$0xff] (!%p2706_p6), %vm378_vm0, %v377_v1 }
  0x48   : > { %s1874_s30 = sshll.u32 %s349_s8, 5  ;;  %s1877_s13 = sshll.u32 %s349_s8, 6 }
  0x49   : > { %s352_s15 = scalar_lea.vmem %s2691_s2, %s1874_s30  ;;  %s2500_s18 = scalar_lea.vmem %s2692_s3, %s1874_s30 }
  0x4a   : > { %s2505_s21 = scalar_lea.vmem %s2693_s4, %s1874_s30  ;;  %s2510_s26 = scalar_lea.vmem %s2694_s5, %s1877_s13 }
  0x4b   : > { %s1827_s29 = sshll.u32 %s349_s8, 3 }
  0x4c   : > { %s2515_s27 = scalar_lea.vmem %s2695_s6, %s1827_s29 }
  0x4e PF: > { %v391_v2 = vld [vmem:[%s352_s15] sm:$0xff]  ;;  %v392_v3 = vld [vmem:[%s352_s15 + $0x8] sm:$0xff]  ;;  %v393_v4 = vld [vmem:[%s352_s15 + $0x10] sm:$0xff]  ;;  %vm399_vm1 = vcmask 261120   ;;  %vm499_vm2 = vcmask 64512   ;;  %s2359_s11 = smov 112  }
  0x4f   : > { %v2046_v5 = vpack.c.bf16 %v392_v3, %v391_v2  ;;  %v394_v6 = vld [vmem:[%s352_s15 + $0x18] sm:$0xff]  ;;  %v2519_v7 = vld [vmem:[#allocation2] sm:$0xff]  ;;  %v2523_v9 = vld [vmem:[#allocation2 + $0x8] sm:$0xff]  ;;  %s2360_s12 = smov 120   ;;  %s2361_s8 = smov 104   ;;  %vm862_vm4 = vcmask 130048  }
  0x50   : > { %v2050_v8 = vpack.c.bf16 %v394_v6, %v393_v4  ;;  %1946 = vmatprep.mubr.msk.f32.mxu1 %vm399_vm1, %v2519_v7  ;;  %v1829_v10 = vld [vmem:[%s2515_s27] ss:$0 sm:$0xff]  ;;  %s2362_s30 = smov 96   ;;  %vm2544_vm3 = vmpackc.low %vm499_vm2, %vm499_vm2  ;;  %v853_v43 = vld [vmem:[#allocation6 + $0x8] sm:$0xff]  ;;  %s2363_s13 = smov 64   ;;  %vm1327_vm5 = vcmask 195584  }
  0x51   : > { %2047 = vmatprep.subr.bf16.mxu1 %v2046_v5  ;;  %v852_v46 = vld [vmem:[#allocation6] sm:$0xff]  ;;  %s2364_s28 = smov 8   ;;  %s2365_s14 = smov 16   ;;  %vm1563_vm6 = vcmask 523264  }
  0x52   : > { %2049 = vmatpush3.bf16.msra.mxu1 %v2046_v5  ;;  %s2366_s15 = smov 24   ;;  %p1869_p10 = scmp.ne.s32.totalorder %s2415_s25, 1 }
  0x53   : > { %2051 = vmatprep.subr.bf16.mxu1 %v2050_v8 }
  0x56   : > { %2053 = vmatpush3.bf16.msra.mxu1 %v2050_v8 }
  0x59   : > { %1947 = vmatmul.mubr.msk.f32.vlgmr.msra.gmra.mrb[0].mxu1 %vm399_vm1, %v2523_v9 }
 0x12c   : > { %v1948_v11 = vpop.f32.mrb[0].mxu1 }
 0x12d   : > { %v478_v12 = vadd.f32 %v1948_v11, %v1829_v10  ;;  %v472_v13 = vpop.f32.mrb[1].mxu1 }
 0x12e   : > { %v473_v14 = vadd.f32 %v1829_v10, %v472_v13 }
 0x12f   : > { %489 = vrot.lane.b32.xlu1 %v478_v12, %s2359_s11 }
 0x130   : > { %483 = vrot.lane.b32.xlu0 %v473_v14, %s2360_s12  ;;  %1953 = vmatprep.mubr.msk.f32.mxu1 %vm499_vm2, %v473_v14  ;;  %v2529_v15 = vpack.i.bf16 %v478_v12, %v473_v14 }
 0x133   : > { %487 = vrot.lane.b32.xlu1 %v473_v14, %s2359_s11 }
 0x134   : > { %485 = vrot.lane.b32.xlu0 %v478_v12, %s2360_s12 }
 0x137   : > { %493 = vrot.lane.b32.xlu1 %v478_v12, %s2361_s8 }
 0x138   : > { %491 = vrot.lane.b32.xlu0 %v473_v14, %s2361_s8 }
 0x13c   : > { %2174 = vrot.lane.b32.xlu0 %v2529_v15, %s2362_s30 }
 0x1a1   : > { %v490_v16 = vpop.permute.xlu1 %489 }
 0x1a2   : > { %v484_v17 = vpop.permute.xlu0 %483 }
 0x1a3   : > { %1960 = vmatprep.mubr.msk.f32.mxu0 %vm499_vm2, %v484_v17 }
 0x1a5   : > { %v488_v18 = vpop.permute.xlu1 %487 }
 0x1a6   : > { %v2533_v19 = vpack.i.bf16 %v490_v16, %v488_v18  ;;  %v486_v20 = vpop.permute.xlu0 %485 }
 0x1a7   : > { %v2535_v21 = vpack.i.bf16 %v486_v20, %v484_v17 }
 0x1a8   : > { %2184 = vrot.lane.b32.xlu0 %v2533_v19, %s2362_s30 }
 0x1a9   : > { %v494_v22 = vpop.permute.xlu1 %493  ;;  %2179 = vrot.lane.b32.xlu1 %v2535_v21, %s2362_s30 }
 0x1aa   : > { %v492_v23 = vpop.permute.xlu0 %491 }
 0x1ab   : > { %v2539_v24 = vpack.i.bf16 %v494_v22, %v492_v23 }
 0x1ad   : > { %2189 = vrot.lane.b32.xlu1 %v2539_v24, %s2362_s30 }
 0x1ae   : > { %v2175_v25 = vpop.permute.xlu0 %2174 }
 0x1af   : > { %v2177_v26 = vunpack.i.h.bf16 %v2175_v25  ;;  %v2176_v27 = vunpack.i.l.bf16 %v2175_v25 }
 0x1b1   : > { %v2054_v29 = vpack.c.bf16 %v2177_v26, %v2176_v27 }
 0x1b3   : > { %2056 = vmatprep.subr.msk.bf16.mxu1 %vm2544_vm3, %v2054_v29 }
 0x1b4   : > { %2059 = vmatpush3.bf16.xpose.msk.msra.mxu1 %vm2544_vm3, %v2054_v29 }
 0x1bb   : > { %1954 = vmatmul.mubr.msk.f32.vlgmr.msra.gmra.mrb[2].mxu1 %vm499_vm2, %v478_v12 }
 0x1bc   : > { %1967 = vmatprep.mubr.msk.f32.mxu1 %vm499_vm2, %v488_v18 }
 0x21a   : > { %v2185_v30 = vpop.permute.xlu0 %2184 }
 0x21b   : > { %v2187_v31 = vunpack.i.h.bf16 %v2185_v30  ;;  %v2186_v32 = vunpack.i.l.bf16 %v2185_v30  ;;  %v2180_v33 = vpop.permute.xlu1 %2179 }
 0x21c   : > { %v2182_v34 = vunpack.i.h.bf16 %v2180_v33  ;;  %v2181_v35 = vunpack.i.l.bf16 %v2180_v33 }
 0x21d   : > { %v2066_v36 = vpack.c.bf16 %v2187_v31, %v2186_v32 }
 0x21e   : > { %v2060_v37 = vpack.c.bf16 %v2182_v34, %v2181_v35 }
 0x21f   : > { %v2190_v38 = vpop.permute.xlu1 %2189  ;;  %2068 = vmatprep.subr.msk.bf16.mxu1 %vm2544_vm3, %v2066_v36 }
 0x220   : > { %v2192_v39 = vunpack.i.h.bf16 %v2190_v38  ;;  %v2191_v40 = vunpack.i.l.bf16 %v2190_v38  ;;  %2062 = vmatprep.subr.msk.bf16.mxu0 %vm2544_vm3, %v2060_v37  ;;  %2071 = vmatpush3.bf16.xpose.msk.msra.mxu1 %vm2544_vm3, %v2066_v36 }
 0x221   : > { %2065 = vmatpush3.bf16.xpose.msk.msra.mxu0 %vm2544_vm3, %v2060_v37 }
 0x222   : > { %v2072_v41 = vpack.c.bf16 %v2192_v39, %v2191_v40 }
 0x224   : > { %2074 = vmatprep.subr.msk.bf16.mxu0 %vm2544_vm3, %v2072_v41 }
 0x227   : > { %1968 = vmatmul.mubr.msk.f32.vlgmr.msra.gmra.mrb[4].mxu1 %vm499_vm2, %v490_v16 }
 0x228   : > { %1961 = vmatmul.mubr.msk.f32.vlgmr.msra.gmra.mrb[0].mxu0 %vm499_vm2, %v486_v20 }
 0x229   : > { %2077 = vmatpush3.bf16.xpose.msk.msra.mxu0 %vm2544_vm3, %v2072_v41  ;;  %1974 = vmatprep.mubr.msk.f32.mxu0 %vm499_vm2, %v492_v23 }
 0x230   : > { %1975 = vmatmul.mubr.msk.f32.vlgmr.msra.gmra.mrb[2].mxu0 %vm499_vm2, %v494_v22 }
 0x28e   : > { %v1955_v42 = vpop.f32.mrb[2].mxu1 }
 0x28f   : > { %v845_v44 = vmul.f32 0.35355338, %v1955_v42  ;;  %v574_v45 = vpop.f32.mrb[3].mxu1 }
 0x290   : > { %v844_v47 = vmul.f32 0.35355338, %v574_v45 }
 0x291   : > { %v855_v48 = vadd.f32 %v853_v43, %v845_v44 }
 0x292   : > { %v854_v49 = vadd.f32 %v852_v46, %v844_v47 }
 0x293   : > { %v866_v50 = vsel %vm862_vm4, %v855_v48, -inf }
 0x294   : > { %867 = vmax.xlane.f32.xlu1 %v866_v50  ;;  %v863_v51 = vsel %vm862_vm4, %v854_v49, -inf }
 0x295   : > { %864 = vmax.xlane.f32.xlu0 %v863_v51 }
 0x2fa   : > { %v1969_v52 = vpop.f32.mrb[4].mxu1 }
 0x2fb   : > { %v1962_v53 = vpop.f32.mrb[0].mxu0  ;;  %v748_v54 = vpop.f32.mrb[5].mxu1  ;;  %v849_v61 = vmul.f32 0.35355338, %v1969_v52 }
 0x2fc   : > { %v847_v55 = vmul.f32 0.35355338, %v1962_v53  ;;  %v848_v56 = vmul.f32 0.35355338, %v748_v54  ;;  %v661_v57 = vpop.f32.mrb[1].mxu0 }
 0x2fd   : > { %v846_v58 = vmul.f32 0.35355338, %v661_v57  ;;  %v859_v5 = vadd.f32 %v853_v43, %v849_v61 }
 0x2fe   : > { %v857_v59 = vadd.f32 %v853_v43, %v847_v55  ;;  %v858_v60 = vadd.f32 %v852_v46, %v848_v56 }
 0x2ff   : > { %v856_v0 = vadd.f32 %v852_v46, %v846_v58  ;;  %v878_v10 = vsel %vm862_vm4, %v859_v5, -inf }
 0x300   : > { %v872_v62 = vsel %vm862_vm4, %v857_v59, -inf  ;;  %v875_v63 = vsel %vm862_vm4, %v858_v60, -inf }
 0x301   : > { %873 = vmax.xlane.f32.xlu0 %v872_v62  ;;  %876 = vmax.xlane.f32.xlu1 %v875_v63  ;;  %v869_v4 = vsel %vm862_vm4, %v856_v0, -inf }
 0x303   : > { %v1976_v1 = vpop.f32.mrb[2].mxu0 }
 0x304   : > { %v851_v2 = vmul.f32 0.35355338, %v1976_v1  ;;  %v835_v3 = vpop.f32.mrb[3].mxu0 }
 0x305   : > { %v850_v6 = vmul.f32 0.35355338, %v835_v3  ;;  %870 = vmax.xlane.f32.xlu0 %v869_v4 }
 0x306   : > { %v861_v11 = vadd.f32 %v853_v43, %v851_v2 }
 0x307   : > { %v2575_v8 = vadd.f32 %v852_v46, %v850_v6 }
 0x308   : > { %v884_v13 = vsel %vm862_vm4, %v861_v11, -inf }
 0x309   : > { %879 = vmax.xlane.f32.xlu0 %v878_v10  ;;  %v881_v12 = vsel %vm862_vm4, %v2575_v8, -inf }
 0x30a   : > { %882 = vmax.xlane.f32.xlu1 %v881_v12 }
 0x30d   : > { %885 = vmax.xlane.f32.xlu0 %v884_v13 }
 0x31b   : > { %2194 = vrot.lane.b32.xlu1 %v2529_v15, %s2363_s13 }
 0x321   : > { %v868_v14 = vpop.xlane.xlu1 %867 }
 0x322   : > { %v888_v16 = vsub.f32 %v855_v48, %v868_v14  ;;  %v865_v18 = vpop.xlane.xlu0 %864 }
 0x323   : > { %v887_v20 = vsub.f32 %v854_v49, %v865_v18 }
 0x324   : > { %v897_v17 = vmul.f32 1.442695, %v888_v16 }
 0x325   : > { %v895_v22 = vmul.f32 1.442695, %v887_v20 }
 0x326   : > { %2213 = vpow2.f32 %v897_v17 }
 0x327   : > { %2215 = vpow2.f32 %v895_v22 }
 0x330   : > { %v2214_v23 = vpop.eup %2213 }
 0x331   : > { %v914_v25 = vsel %vm862_vm4, %v2214_v23, 0.0  ;;  %v2216_v26 = vpop.eup %2215 }
 0x332   : > { %915 = vadd.xlane.f32.xlu0 %v914_v25  ;;  %v911_v27 = vsel %vm862_vm4, %v2216_v26, 0.0 }
 0x33f   : > { %912 = vadd.xlane.f32.xlu1 %v911_v27 }
 0x38e   : > { %v874_v28 = vpop.xlane.xlu0 %873  ;;  %v877_v29 = vpop.xlane.xlu1 %876 }
 0x38f   : > { %v890_v30 = vsub.f32 %v857_v59, %v874_v28  ;;  %v891_v31 = vsub.f32 %v858_v60, %v877_v29 }
 0x391   : > { %v901_v15 = vmul.f32 1.442695, %v890_v30  ;;  %v903_v34 = vmul.f32 1.442695, %v891_v31 }
 0x392   : > { %v871_v32 = vpop.xlane.xlu0 %870 }
 0x393   : > { %2217 = vpow2.f32 %v901_v15  ;;  %v889_v33 = vsub.f32 %v856_v0, %v871_v32 }
 0x395   : > { %v899_v35 = vmul.f32 1.442695, %v889_v33 }
 0x396   : > { %v880_v36 = vpop.xlane.xlu0 %879 }
 0x397   : > { %2219 = vpow2.f32 %v899_v35  ;;  %v892_v37 = vsub.f32 %v859_v5, %v880_v36  ;;  %v883_v38 = vpop.xlane.xlu1 %882 }
 0x398   : > { %2221 = vpow2.f32 %v903_v34  ;;  %v893_v57 = vsub.f32 %v2575_v8, %v883_v38  ;;  %v1331_v38 = vld [vmem:[%s2500_s18 + $0x8] sm:$0xff] }
 0x399   : > { %v905_v39 = vmul.f32 1.442695, %v892_v37  ;;  %v1330_v37 = vld [vmem:[%s2500_s18] sm:$0xff] }
 0x39a   : > { %v886_v40 = vpop.xlane.xlu0 %885  ;;  %v907_v59 = vmul.f32 1.442695, %v893_v57 }
 0x39b   : > { %2223 = vpow2.f32 %v905_v39  ;;  %v894_v41 = vsub.f32 %v861_v11, %v886_v40  ;;  %v2195_v42 = vpop.permute.xlu1 %2194  ;;  %v1332_v39 = vld [vmem:[%s2500_s18 + $0x10] sm:$0xff]  ;;  %v2094_v40 = vpack.c.bf16 %v1331_v38, %v1330_v37  ;;  %v1859_v38 = vld [vmem:[%s2515_s27 + $0x4] ss:$0 sm:$0xff] }
 0x39c   : > { %v2197_v43 = vunpack.i.h.bf16 %v2195_v42  ;;  %v2196_v44 = vunpack.i.l.bf16 %v2195_v42 }
 0x39d   : > { %v2585_v45 = vpop.eup %2217  ;;  %v909_v46 = vmul.f32 1.442695, %v894_v41  ;;  %v1333_v41 = vld [vmem:[%s2500_s18 + $0x18] sm:$0xff] }
 0x39e   : > { %v2078_v47 = vpack.c.bf16 %v2197_v43, %v2196_v44  ;;  %v920_v48 = vsel %vm862_vm4, %v2585_v45, 0.0  ;;  %v2098_v42 = vpack.c.bf16 %v1333_v41, %v1332_v39 }
 0x39f   : > { %2225 = vpow2.f32 %v909_v46  ;;  %921 = vadd.xlane.f32.xlu0 %v920_v48 }
 0x3a0   : > { %2079 = vmatprep.subr.bf16.mxu1 %v2078_v47 }
 0x3a1   : > { %v2220_v49 = vpop.eup %2219  ;;  %2081 = vmatpush3.bf16.msra.mxu1 %v2078_v47 }
 0x3a2   : > { %v917_v50 = vsel %vm862_vm4, %v2220_v49, 0.0  ;;  %v2222_v51 = vpop.eup %2221 }
 0x3a3   : > { %918 = vadd.xlane.f32.xlu1 %v917_v50  ;;  %v923_v54 = vsel %vm862_vm4, %v2222_v51, 0.0 }
 0x3a5   : > { %v2224_v52 = vpop.eup %2223 }
 0x3a6   : > { %v926_v53 = vsel %vm862_vm4, %v2224_v52, 0.0 }
 0x3a7   : > { %927 = vadd.xlane.f32.xlu0 %v926_v53  ;;  %924 = vadd.xlane.f32.xlu1 %v923_v54 }
 0x3a9   : > { %v2592_v55 = vpop.eup %2225 }
 0x3aa   : > { %v932_v56 = vsel %vm862_vm4, %v2592_v55, 0.0 }
 0x3ab   : > { %933 = vadd.xlane.f32.xlu0 %v932_v56 }
 0x3b8   : > { %2204 = vrot.lane.b32.xlu1 %v2533_v19, %s2363_s13 }
 0x3bf   : > { %v916_v58 = vpop.xlane.xlu0 %915 }
 0x3c0   : > { %2227 = vrcp.f32 %v916_v58 }
 0x3c1   : > { %2199 = vrot.lane.b32.xlu0 %v2535_v21, %s2363_s13 }
 0x3ca   : > { %v2228_v61 = vpop.eup %2227 }
 0x3cb   : > { %v944_v1 = vmul.f32 %v2228_v61, %v2214_v23  ;;  %v1856_v61 = vld [vmem:[%s2515_s27 + $0x1] ss:$0 sm:$0xff] }
 0x3cc   : > { %v913_v60 = vpop.xlane.xlu1 %912 }
 0x3cd   : > { %2229 = vrcp.f32 %v913_v60 }
 0x3ce   : > { %2231 = vpow2.f32 %v907_v59 }
 0x3d7   : > { %v2230_v62 = vpop.eup %2229 }
 0x3d8   : > { %v2232_v63 = vpop.eup %2231  ;;  %v943_v0 = vmul.f32 %v2230_v62, %v2216_v26 }
 0x3d9   : > { %v929_v19 = vsel %vm862_vm4, %v2232_v63, 0.0 }
 0x3da   : > { %1981 = vmatprep.mubr.msk.f32.mxu1 %vm862_vm4, %v943_v0 }
 0x3db   : > { %1982 = vmatmul.mubr.msk.f32.vlgmr.msra.gmra.mrb[6].mxu1 %vm862_vm4, %v944_v1 }
 0x3dc   : > { %930 = vadd.xlane.f32.xlu1 %v929_v19 }
 0x3ed   : > { %2209 = vrot.lane.b32.xlu1 %v2539_v24, %s2363_s13 }
 0x42c   : > { %v922_v21 = vpop.xlane.xlu0 %921 }
 0x430   : > { %v919_v2 = vpop.xlane.xlu1 %918 }
 0x431   : > { %2233 = vrcp.f32 %v919_v2 }
 0x432   : > { %2235 = vrcp.f32 %v922_v21 }
 0x434   : > { %v928_v3 = vpop.xlane.xlu0 %927  ;;  %v925_v4 = vpop.xlane.xlu1 %924 }
 0x435   : > { %2237 = vrcp.f32 %v928_v3 }
 0x436   : > { %2239 = vrcp.f32 %v925_v4 }
 0x438   : > { %v934_v5 = vpop.xlane.xlu0 %933  ;;  %v2205_v6 = vpop.permute.xlu1 %2204 }
 0x439   : > { %v2207_v8 = vunpack.i.h.bf16 %v2205_v6  ;;  %v2206_v10 = vunpack.i.l.bf16 %v2205_v6  ;;  %2241 = vrcp.f32 %v934_v5 }
 0x43b   : > { %v2234_v11 = vpop.eup %2233  ;;  %v2086_v12 = vpack.c.bf16 %v2207_v8, %v2206_v10 }
 0x43c   : > { %v2200_v13 = vpop.permute.xlu0 %2199  ;;  %v945_v14 = vmul.f32 %v2234_v11, %v2220_v49  ;;  %v2236_v24 = vpop.eup %2235 }
 0x43d   : > { %v2202_v16 = vunpack.i.h.bf16 %v2200_v13  ;;  %v2201_v17 = vunpack.i.l.bf16 %v2200_v13  ;;  %2087 = vmatprep.subr.bf16.mxu0 %v2086_v12  ;;  %v946_v26 = vmul.f32 %v2236_v24, %v2585_v45  ;;  %v1462_v24 = vld [vmem:[%s2505_s21 + $0x10] sm:$0xff] }
 0x43e   : > { %1988 = vmatprep.mubr.msk.f32.mxu1 %vm862_vm4, %v945_v14  ;;  %2089 = vmatpush3.bf16.msra.mxu0 %v2086_v12  ;;  %v1460_v14 = vld [vmem:[%s2505_s21] sm:$0xff] }
 0x43f   : > { %v2238_v18 = vpop.eup %2237  ;;  %v2082_v20 = vpack.c.bf16 %v2202_v16, %v2201_v17  ;;  %2095 = vmatprep.subr.bf16.mxu0 %v2094_v40  ;;  %v1461_v16 = vld [vmem:[%s2505_s21 + $0x8] sm:$0xff] }
 0x440   : > { %v2240_v22 = vpop.eup %2239  ;;  %v948_v23 = vmul.f32 %v2238_v18, %v2224_v52  ;;  %v2102_v17 = vpack.c.bf16 %v1461_v16, %v1460_v14  ;;  %v1463_v18 = vld [vmem:[%s2505_s21 + $0x18] sm:$0xff] }
 0x441   : > { %2083 = vmatprep.subr.bf16.mxu1 %v2082_v20  ;;  %v947_v25 = vmul.f32 %v2240_v22, %v2222_v51  ;;  %v1551_v22 = vld [vmem:[%s2510_s26] sm:$0xff] }
 0x442   : > { %2085 = vmatpush3.bf16.msra.mxu1 %v2082_v20  ;;  %v2106_v20 = vpack.c.bf16 %v1463_v18, %v1462_v24  ;;  %v1867_v24 = vld [vmem:[%s2515_s27 + $0x6] ss:$0 sm:$0xff] }
 0x443   : > { %1995 = vmatprep.mubr.msk.f32.mxu0 %vm862_vm4, %v947_v25  ;;  %v2242_v31 = vpop.eup %2241  ;;  %v1553_v25 = vld [vmem:[%s2510_s26 + $0x10] sm:$0xff] }
 0x444   : > { %1996 = vmatmul.mubr.msk.f32.vlgmr.msra.gmra.mrb[4].mxu0 %vm862_vm4, %v948_v23  ;;  %v950_v34 = vmul.f32 %v2242_v31, %v2592_v55  ;;  %v1552_v23 = vld [vmem:[%s2510_s26 + $0x8] sm:$0xff] }
 0x445   : > { %1989 = vmatmul.mubr.msk.f32.vlgmr.msra.gmra.mrb[8].mxu1 %vm862_vm4, %v946_v26  ;;  %2097 = vmatpush3.bf16.msra.mxu0 %v2094_v40  ;;  %v2110_v26 = vpack.c.bf16 %v1552_v23, %v1551_v22  ;;  %v1860_v40 = vld [vmem:[%s2515_s27 + $0x5] ss:$0 sm:$0xff]  ;;  %v1868_v22 = vld [vmem:[%s2515_s27 + $0x7] ss:$0 sm:$0xff] }
 0x446   : > { %2099 = vmatprep.subr.bf16.mxu0 %v2098_v42 }
 0x449   : > { %2101 = vmatpush3.bf16.msra.mxu0 %v2098_v42 }
 0x44a   : > { %2111 = vmatprep.subr.bf16.mxu0 %v2110_v26 }
 0x469   : > { %v931_v27 = vpop.xlane.xlu1 %930 }
 0x46a   : > { %2243 = vrcp.f32 %v931_v27  ;;  %v1554_v27 = vld [vmem:[%s2510_s26 + $0x18] sm:$0xff] }
 0x46d   : > { %v2210_v28 = vpop.permute.xlu1 %2209 }
 0x46e   : > { %v2212_v29 = vunpack.i.h.bf16 %v2210_v28  ;;  %v2211_v30 = vunpack.i.l.bf16 %v2210_v28  ;;  %v2114_v28 = vpack.c.bf16 %v1554_v27, %v1553_v25 }
 0x470   : > { %v2090_v15 = vpack.c.bf16 %v2212_v29, %v2211_v30  ;;  %v1555_v29 = vld [vmem:[%s2510_s26 + $0x20] sm:$0xff]  ;;  %v1556_v30 = vld [vmem:[%s2510_s26 + $0x28] sm:$0xff] }
 0x472   : > { %2091 = vmatprep.subr.bf16.mxu1 %v2090_v15 }
 0x473   : > { %2093 = vmatpush3.bf16.msra.mxu1 %v2090_v15  ;;  %v2118_v15 = vpack.c.bf16 %v1556_v30, %v1555_v29 }
 0x474   : > { %v2244_v32 = vpop.eup %2243  ;;  %2103 = vmatprep.subr.bf16.mxu1 %v2102_v17 }
 0x475   : > { %v949_v33 = vmul.f32 %v2244_v32, %v2232_v63 }
 0x477   : > { %2002 = vmatprep.mubr.msk.f32.mxu1 %vm862_vm4, %v949_v33 }
 0x478   : > { %2003 = vmatmul.mubr.msk.f32.vlgmr.msra.gmra.mrb[10].mxu1 %vm862_vm4, %v950_v34 }
 0x479   : > { %2105 = vmatpush3.bf16.msra.mxu1 %v2102_v17 }
 0x47a   : > { %2107 = vmatprep.subr.bf16.mxu1 %v2106_v20 }
 0x47d   : > { %2109 = vmatpush3.bf16.msra.mxu1 %v2106_v20 }
 0x4ae   : > { %v1983_v35 = vpop.f32.mrb[6].mxu1 }
 0x4af   : > { %v1029_v36 = vpop.f32.mrb[7].mxu1 }
 0x517   : > { %v1997_v43 = vpop.f32.mrb[4].mxu0 }
 0x518   : > { %v1203_v44 = vpop.f32.mrb[5].mxu0  ;;  %v1990_v45 = vpop.f32.mrb[8].mxu1 }
 0x519   : > { %1303 = vrot.lane.b32.xlu1 %v1990_v45, %s2364_s28  ;;  %v1116_v46 = vpop.f32.mrb[9].mxu1 }
 0x51a   : > { %1301 = vrot.lane.b32.xlu0 %v1116_v46, %s2364_s28 }
 0x51d   : > { %1311 = vrot.lane.b32.xlu1 %v1997_v43, %s2365_s14 }
 0x51e   : > { %1309 = vrot.lane.b32.xlu0 %v1203_v44, %s2365_s14 }
 0x54b   : > { %v2004_v47 = vpop.f32.mrb[10].mxu1 }
 0x54c   : > { %1319 = vrot.lane.b32.xlu1 %v2004_v47, %s2366_s15  ;;  %v1290_v48 = vpop.f32.mrb[11].mxu1  ;;  %v1557_v47 = vld [vmem:[%s2510_s26 + $0x30] sm:$0xff] }
 0x54d   : > { %1317 = vrot.lane.b32.xlu0 %v1290_v48, %s2366_s15  ;;  %v1558_v48 = vld [vmem:[%s2510_s26 + $0x38] sm:$0xff] }
 0x58b   : > { %v1304_v49 = vpop.permute.xlu1 %1303 }
 0x58c   : > { %v1302_v50 = vpop.permute.xlu0 %1301  ;;  %v1324_v55 = vsel %vm499_vm2, %v1983_v35, %v1304_v49  ;;  %v2122_v49 = vpack.c.bf16 %v1558_v48, %v1557_v47 }
 0x58d   : > { %v1323_v53 = vsel %vm499_vm2, %v1029_v36, %v1302_v50  ;;  %v1861_v50 = vld [vmem:[%s2515_s27 + $0x2] ss:$0 sm:$0xff] }
 0x58f   : > { %v1312_v51 = vpop.permute.xlu1 %1311 }
 0x590   : > { %v1310_v52 = vpop.permute.xlu0 %1309  ;;  %v1326_v58 = vsel %vm862_vm4, %v1324_v55, %v1312_v51 }
 0x591   : > { %v1325_v56 = vsel %vm862_vm4, %v1323_v53, %v1310_v52 }
 0x5be   : > { %v1320_v54 = vpop.permute.xlu1 %1319 }
 0x5bf   : > { %v1318_v57 = vpop.permute.xlu0 %1317  ;;  %v1329_v60 = vsel %vm1327_vm5, %v1326_v58, %v1320_v54 }
 0x5c0   : > { %v1328_v59 = vsel %vm1327_vm5, %v1325_v56, %v1318_v57  ;;  %v1864_v57 = vld [vmem:[%s2515_s27 + $0x3] ss:$0 sm:$0xff] }
 0x5c1   : > { %2013 = vmatprep.mubr.msk.f32.mxu0 %vm399_vm1, %v1328_v59 }
 0x5c2   : > { %2014 = vmatmul.mubr.msk.f32.vlgmr.msra.gmra.mrb[6].mxu0 %vm399_vm1, %v1329_v60 }
 0x5c3   : > { %2113 = vmatpush3.bf16.msra.mxu0 %v2110_v26 }
 0x5c4   : > { %2115 = vmatprep.subr.bf16.mxu0 %v2114_v28 }
 0x5c7   : > { %2117 = vmatpush3.bf16.msra.mxu0 %v2114_v28 }
 0x5c8   : > { %2119 = vmatprep.subr.bf16.mxu0 %v2118_v15 }
 0x5cb   : > { %2121 = vmatpush3.bf16.msra.mxu0 %v2118_v15 }
 0x5cc   : > { %2123 = vmatprep.subr.bf16.mxu0 %v2122_v49 }
 0x5cf   : > { %2125 = vmatpush3.bf16.msra.mxu0 %v2122_v49 }
 0x695   : > { %v2015_v62 = vpop.f32.mrb[6].mxu0 }
 0x696   : > { %v1416_v63 = vadd.f32 %v2015_v62, %v1856_v61  ;;  %v1410_v0 = vpop.f32.mrb[7].mxu0 }
 0x697   : > { %v1411_v1 = vadd.f32 %v1856_v61, %v1410_v0 }
 0x698   : > { %v1420_v19 = vadd.f32 %v1416_v63, %v2523_v9 }
 0x699   : > { %v1419_v21 = vadd.f32 %v1411_v1, %v2519_v7 }
 0x69a   : > { %v1424_v2 = vsel %vm399_vm1, %v1420_v19, 0.0 }
 0x69b   : > { %1425 = vadd.xlane.f32.xlu1 %v1424_v2  ;;  %v1421_v3 = vsel %vm399_vm1, %v1419_v21, 0.0 }
 0x69c   : > { %1422 = vadd.xlane.f32.xlu0 %v1421_v3 }
 0x728   : > { %v1426_v4 = vpop.xlane.xlu1 %1425 }
 0x729   : > { %v1429_v5 = vmul.f32 0.03125, %v1426_v4  ;;  %v1423_v6 = vpop.xlane.xlu0 %1422 }
 0x72a   : > { %v1428_v8 = vmul.f32 0.03125, %v1423_v6 }
 0x72b   : > { %v1431_v10 = vsub.f32 %v1420_v19, %v1429_v5 }
 0x72c   : > { %v1430_v11 = vsub.f32 %v1419_v21, %v1428_v8 }
 0x72d   : > { %v1433_v9 = vmul.f32 %v1431_v10, %v1431_v10 }
 0x72e   : > { %v1432_v12 = vmul.f32 %v1430_v11, %v1430_v11 }
 0x72f   : > { %v1437_v13 = vsel %vm399_vm1, %v1433_v9, 0.0 }
 0x730   : > { %v1434_v7 = vsel %vm399_vm1, %v1432_v12, 0.0 }
 0x731   : > { %1435 = vadd.xlane.f32.xlu0 %v1434_v7 }
 0x735   : > { %1438 = vadd.xlane.f32.xlu0 %v1437_v13 }
 0x7be   : > { %v1436_v31 = vpop.xlane.xlu0 %1435 }
 0x7bf   : > { %v1440_v32 = vmul.f32 0.03125, %v1436_v31 }
 0x7c1   : > { %v1442_v33 = vadd.f32 1e-05, %v1440_v32 }
 0x7c2   : > { %v1439_v34 = vpop.xlane.xlu0 %1438 }
 0x7c3   : > { %2245 = vrsqrt.f32 %v1442_v33  ;;  %v1441_v35 = vmul.f32 0.03125, %v1439_v34 }
 0x7c5   : > { %v1443_v36 = vadd.f32 1e-05, %v1441_v35 }
 0x7c7   : > { %2247 = vrsqrt.f32 %v1443_v36 }
 0x7cd   : > { %v2246_v37 = vpop.eup %2245 }
 0x7ce   : > { %v1446_v39 = vmul.f32 %v2246_v37, %v1430_v11 }
 0x7d0   : > { %v1452_v41 = vmul.f32 %v1859_v38, %v1446_v39 }
 0x7d1   : > { %v2248_v42 = vpop.eup %2247 }
 0x7d2   : > { %v1447_v43 = vmul.f32 %v2248_v42, %v1431_v10  ;;  %v1458_v44 = vadd.f32 %v1860_v40, %v1452_v41 }
 0x7d4   : > { %v1453_v45 = vmul.f32 %v1859_v38, %v1447_v43  ;;  %2024 = vmatprep.mubr.msk.f32.mxu1 %vm399_vm1, %v1458_v44 }
 0x7d6   : > { %v1459_v46 = vadd.f32 %v1860_v40, %v1453_v45 }
 0x7d8   : > { %2025 = vmatmul.mubr.msk.f32.vlgmr.msra.gmra.mrb[12].mxu1 %vm399_vm1, %v1459_v46 }
 0x8ab   : > { %v2026_v51 = vpop.f32.mrb[12].mxu1 }
 0x8ac   : > { %v1546_v52 = vadd.f32 %v2026_v51, %v1861_v50  ;;  %v1540_v53 = vpop.f32.mrb[13].mxu1 }
 0x8ad   : > { %v1541_v54 = vadd.f32 %v1861_v50, %v1540_v53 }
 0x8ae   : > { %v1550_v56 = vmax.f32 %v1546_v52, 0.0 }
 0x8af   : > { %v1549_v55 = vmax.f32 %v1541_v54, 0.0 }
 0x8b1   : > { %2043 = vmatprep.mubr.msk.f32.mxu0 %vm1563_vm6, %v1549_v55 }
 0x8b2   : > { %2044 = vmatmul.mubr.msk.f32.vlgmr.msra.gmra.mrb[8].mxu0 %vm1563_vm6, %v1550_v56 }
 0x985   : > { %v2045_v58 = vpop.f32.mrb[8].mxu0 }
 0x986   : > { %v1642_v59 = vadd.f32 %v2045_v58, %v1864_v57  ;;  %v1636_v60 = vpop.f32.mrb[9].mxu0 }
 0x987   : > { %v1637_v61 = vadd.f32 %v1864_v57, %v1636_v60 }
 0x988   : > { %v1646_v62 = vadd.f32 %v1642_v59, %v1459_v46 }
 0x989   : > { %v1645_v63 = vadd.f32 %v1637_v61, %v1458_v44 }
 0x98a   : > { %v1650_v0 = vsel %vm399_vm1, %v1646_v62, 0.0 }
 0x98b   : > { %1651 = vadd.xlane.f32.xlu0 %v1650_v0  ;;  %v1647_v1 = vsel %vm399_vm1, %v1645_v63, 0.0 }
 0x98c   : > { %1648 = vadd.xlane.f32.xlu1 %v1647_v1 }
 0xa18   : > { %v1652_v19 = vpop.xlane.xlu0 %1651 }
 0xa19   : > { %v1654_v21 = vmul.f32 0.03125, %v1652_v19  ;;  %v1649_v2 = vpop.xlane.xlu1 %1648 }
 0xa1a   : > { %v1653_v3 = vmul.f32 0.03125, %v1649_v2 }
 0xa1b   : > { %v1656_v4 = vsub.f32 %v1646_v62, %v1654_v21 }
 0xa1c   : > { %v1655_v5 = vsub.f32 %v1645_v63, %v1653_v3 }
 0xa1d   : > { %v1658_v6 = vmul.f32 %v1656_v4, %v1656_v4 }
 0xa1e   : > { %v1657_v8 = vmul.f32 %v1655_v5, %v1655_v5 }
 0xa1f   : > { %v1662_v10 = vsel %vm399_vm1, %v1658_v6, 0.0 }
 0xa20   : > { %1663 = vadd.xlane.f32.xlu0 %v1662_v10  ;;  %v1659_v11 = vsel %vm399_vm1, %v1657_v8, 0.0 }
 0xa21   : > { %1660 = vadd.xlane.f32.xlu1 %v1659_v11 }
 0xaad   : > { %v1664_v12 = vpop.xlane.xlu0 %1663 }
 0xaae   : > { %v1666_v7 = vmul.f32 0.03125, %v1664_v12  ;;  %v1661_v9 = vpop.xlane.xlu1 %1660 }
 0xaaf   : > { %v1665_v13 = vmul.f32 0.03125, %v1661_v9 }
 0xab0   : > { %v1668_v14 = vadd.f32 1e-05, %v1666_v7 }
 0xab1   : > { %v1667_v16 = vadd.f32 1e-05, %v1665_v13 }
 0xab2   : > { %2249 = vrsqrt.f32 %v1668_v14 }
 0xab3   : > { %2251 = vrsqrt.f32 %v1667_v16 }
 0xabc   : > { %v2250_v17 = vpop.eup %2249 }
 0xabd   : > { %v2252_v18 = vpop.eup %2251  ;;  %v1672_v20 = vmul.f32 %v2250_v17, %v1656_v4 }
 0xabe   : > { %v1671_v23 = vmul.f32 %v2252_v18, %v1655_v5  ;;  %1690 = sbr.rel (%p1869_p10) target bundleno = 2757 (0xac5), region = 64 }
 0xabf   : > { %v1678_v25 = vmul.f32 %v1867_v24, %v1672_v20 }
 0xac0   : > { %v1677_v26 = vmul.f32 %v1867_v24, %v1671_v23 }
 0xac1   : > { %v1684_v27 = vadd.f32 %v1868_v22, %v1678_v25 }
 0xac2   : > { %v1683_v28 = vadd.f32 %v1868_v22, %v1677_v26 }
 0xac3   : > { %1686 = vst.msk [vmem:[#allocation2 + $0x8] sm:$0xff] %vm399_vm1, %v1684_v27  ;;  %1692 = vst.msk [vmem:[#allocation8 + $0x8] sm:$0xff] (!%p1869_p10), %vm399_vm1, %v1684_v27 }
 0xac4   : > { %1685 = vst.msk [vmem:[#allocation2] sm:$0xff] %vm399_vm1, %v1683_v28  ;;  %1691 = vst.msk [vmem:[#allocation8] sm:$0xff] (!%p1869_p10), %vm399_vm1, %v1683_v28 }
 0xac5 PF: > { %p2149_p11 = scmp.eq.s32.totalorder %s2415_s25, 1  ;;  %s2367_s16 = smov [#allocation8]  }
 0xac6   : > { %s1699_s17 = sshll.u32 %s2367_s16, 4  ;;  %s1700_s17 = int_to_ptr.vmem [resolvable:$true] %s1699_s17 }
 0xac7   : > { %s2309_s18 = scalar_lea.vmem %s1700_s17, 256  ;;  %p2316_p1 = scmp.lt.s32.totalorder %s1700_s17, %s1700_s17 }
 0xac8   : > { %p2310_p12 = scmp.ne.s32.totalorder %s1700_s17, %s2309_s18  ;;  %p2317_p5 = scmp.lt.s32.totalorder %s2309_s18, %s2309_s18 }
 0xaca   : > { %p2311_p13 = pnand %p2310_p12, %p2149_p11  ;;  %p2318_p7 = por %p2317_p5, %p2316_p1 }
 0xacc   : > { %p2312_p0 = pneg %p2311_p13 }
 0xace   : > { %p2319_p2 = pnand %p2318_p7, %p2312_p0 }
 0xad0   : > { %2322 = shalt.err (!%p2319_p2)
}
 0xad1   : > { %s2323_s21 = scalar_lea.hbm %s2696_s7, 256 }
 0xad2   : > { %p2324_p8 = scmp.ne.s32.totalorder %s2696_s7, %s2323_s21  ;;  %p2329_p9 = scmp.lt.u32.totalorder %s2323_s21, %s2696_s7 }
 0xad4   : > { %p2325_p3 = pnand %p2324_p8, %p2149_p11 }
 0xad6   : > { %p2326_p4 = pneg %p2325_p3 }
 0xad8   : > { %p2331_p6 = pnand %p2329_p9, %p2326_p4 }
 0xada   : > { %2334 = shalt.err (!%p2331_p6)
}
 0xadb   : > { %s2368_s9 = smov 128  }
 0xadc   : > { %2135 = dma.vmem_to_hbm [thread:$0]  (%p2149_p11), %s1700_s17, 256, %s2696_s7, [#allocation5], %s2368_s9, %s2368_s9, %s2364_s28  }
 0xadd   : > { %2348 = dma.done.wait (%p2149_p11), [#allocation5], 256  }
 0xade   : > { %2350 = vsyncadd (%p2149_p11), [#allocation5], 4294967040 }
 0xadf PF: > { %s20_s24 = sadd.s32 1, %s2353_s24  }
 0xae0   : > { %p17_p10 = scmp.ge.s32.totalorder %s20_s24, 4  }
 0xae2   :  { %19 = sbr.rel (!%p17_p10) target bundleno = 3 (0x3), region = 104 }
 0xae9   :  { %1715 = vsyncpa [#allocation4], 1 }
 0xaea   :  { %1717 = vsyncpa [#allocation4 + $0x1], 1 }
 0xaeb   :  { %1718 = vsyncpa [#allocation7], 1 }
 0xaec   :  { %1719 = vsyncpa [#allocation5], 1 }
 0xaed   :  { %1721 = vsyncpa [#allocation5 + $0x1], 1 }

</bundles_post_ra>
